<compile_context>
chip_gen: v6e
topology: v6e:2x2x1
jax: 0.10.0
libtpu: 0.0.40
codegen_flags: <defaults>
</compile_context>

<pallas_src>
import functools

import jax
import jax.numpy as jnp
from jax.experimental import pallas as pl
from jax.experimental.pallas import tpu as pltpu


# ---------------------------------------------------------------------------
# Shared epilogue math: two 3-tap 1-D convs along C mixing all N conv-channels
# (centre kh/kw taps of the Conv3d), ReLU between them, Sigmoid + 1 at the end.
# Used by both the fused streaming kernel and the standalone epilogue kernel.
# ---------------------------------------------------------------------------
def _conv_epilogue(pooled, w1_ref, b1_ref, w2_ref, b2_ref, pad_ref):
    """pooled: (N, C) f32.  w*_ref: (k, out, in).  b*_ref: (N, 1).
    pad_ref: VMEM scratch (N, C + 2).  Returns (N, C) f32."""
    n, c = pooled.shape
    k = w1_ref.shape[0]

    # Zero only the two halo columns once; they stay zero for both convs.
    pad_ref[:, 0:1] = jnp.zeros((n, 1), jnp.float32)
    pad_ref[:, c + 1:c + 2] = jnp.zeros((n, 1), jnp.float32)

    def conv1d(w_ref, bias):
        out = jnp.broadcast_to(bias, (n, c))          # bias hoisted, one bcast
        for t in range(k):                            # static unroll, k == 3
            out = out + jnp.dot(w_ref[t], pad_ref[:, t:t + c],
                                preferred_element_type=jnp.float32)
        return out

    pad_ref[:, 1:c + 1] = pooled
    h = jnp.maximum(conv1d(w1_ref, b1_ref[...]), 0.0)    # Conv_in + ReLU
    pad_ref[:, 1:c + 1] = h
    y = conv1d(w2_ref, b2_ref[...])                      # Conv_out
    return jax.nn.sigmoid(y) + 1.0                       # Sigmoid, + 1


def _accumulate(x_ref, o_ref):
    # f32 accumulation in the resident output block (safe for bf16 inputs on
    # all generations).
    # TODO(synk): on v7x (3.2 TB/s HBM) this VPU cast + XLU lane-reduce can
    # co-bind with the DMA stream; an MXU ones-vector contraction would free
    # those slots, but a rank-3 x rank-1 dot_general is a Mosaic lowering
    # risk, so the proven formulation is kept.
    o_ref[...] += jnp.sum(x_ref[...].astype(jnp.float32), axis=2)


# ---------------------------------------------------------------------------
# Kernel 1a: streaming pool, grid = (C_tiles, HW_tiles).  Output block is a
# resident f32 accumulator across the HW (reduction, last) grid axis.
# ---------------------------------------------------------------------------
def _pool_kernel(x_ref, o_ref, *, inv_hw):
    hi = pl.program_id(1)

    @pl.when(hi == 0)
    def _():
        o_ref[...] = jnp.zeros_like(o_ref)

    _accumulate(x_ref, o_ref)

    @pl.when(hi == pl.num_programs(1) - 1)
    def _():
        o_ref[...] = o_ref[...] * inv_hw


# ---------------------------------------------------------------------------
# Kernel 1b: fused pool + conv epilogue, grid = (HW_tiles,).  Valid whenever
# the C tile is the full C: the resident (N, C) output block first serves as
# the pooling accumulator and is overwritten with the final CA output on the
# last HW step.  Saves a kernel launch + an HBM round-trip of the pooled
# tensor for small problems.
# ---------------------------------------------------------------------------
def _fused_pool_conv_kernel(x_ref, w1_ref, b1_ref, w2_ref, b2_ref, o_ref,
                            pad_ref, *, inv_hw):
    hi = pl.program_id(0)

    @pl.when(hi == 0)
    def _():
        o_ref[...] = jnp.zeros_like(o_ref)

    _accumulate(x_ref, o_ref)

    @pl.when(hi == pl.num_programs(0) - 1)
    def _():
        pooled = o_ref[...] * inv_hw
        o_ref[...] = _conv_epilogue(pooled, w1_ref, b1_ref, w2_ref, b2_ref,
                                    pad_ref)


# ---------------------------------------------------------------------------
# Kernel 2: standalone epilogue (used only when C had to be tiled).
# ---------------------------------------------------------------------------
def _conv_epilogue_kernel(p_ref, w1_ref, b1_ref, w2_ref, b2_ref, o_ref,
                          pad_ref):
    o_ref[...] = _conv_epilogue(p_ref[...], w1_ref, b1_ref, w2_ref, b2_ref,
                                pad_ref)


# ---------------------------------------------------------------------------
# Wrapper helpers
# ---------------------------------------------------------------------------
def _divisor_tile(dim, align, cap):
    """Largest multiple of `align` that divides `dim` and is <= min(cap, dim),
    or None if no such tile exists."""
    if dim <= 0 or dim % align != 0 or cap < align:
        return None
    t = min(cap, dim)
    t -= t % align
    while dim % t != 0:
        t -= align
    return t


def _vmem_budget():
    """Generation-aware (x-block budget, vmem-limit cap, two-TensorCore?)."""
    try:
        vmem_cap = int(pltpu.get_tpu_info().vmem_capacity_bytes)
    except Exception:  # pragma: no cover - conservative fallback
        vmem_cap = 64 * 1024 * 1024
    if vmem_cap <= 64 * 1024 * 1024:
        # v7x-class: 64 MiB VMEM per TC, 2 TCs/chip, 3.2 TB/s HBM.
        block_budget = min(12 * 1024 * 1024, vmem_cap // 5)
        limit_cap = min(48 * 1024 * 1024, (vmem_cap * 3) // 4)
        two_tc = True
    else:
        # v5e / v6e: 128 MiB VMEM, single TC.
        block_budget = 16 * 1024 * 1024
        limit_cap = 100 * 1024 * 1024
        two_tc = False
    return block_budget, limit_cap, two_tc


def ca_module_forward(x, w_in, b_in, w_out, b_out, *, block_budget=None):
    """Pallas implementation of CA_Module.forward.

    x:      (N, C, H, W) with N == in_channel (required by the PyTorch
            module's unbatched Conv3d interpretation of the pooled tensor).
    w_in:   (in_channel, in_channel, k, k, k)   b_in:  (in_channel,)
    w_out:  (in_channel, in_channel, k, k, k)   b_out: (in_channel,)
    returns (in_channel, C, 1, 1)  — same as the PyTorch module.
    """
    n, c, h, w = x.shape
    in_channel = w_in.shape[1]
    kernel_size = w_in.shape[2]
    assert n == in_channel, "Conv3d unbatched semantics require N == in_channel"
    assert kernel_size == 3, "CA_Module with padding=1 implies kernel_size == 3"

    hw = h * w
    itemsize = jnp.dtype(x.dtype).itemsize
    auto_budget, limit_cap, two_tc = _vmem_budget()
    if block_budget is None:
        block_budget = auto_budget

    # Free reshape (contiguous collapse); x is streamed in its native dtype so
    # the kernel reads the original HBM bytes exactly once.
    x3 = x.reshape(n, c, hw)
    hw_pad = 0
    full_bytes = n * c * hw * itemsize

    # ---------------- tile selection ----------------
    if full_bytes <= block_budget:
        # Whole (N, C, HW) volume in a single block.
        c_tile, hw_tile = c, hw
        # v7x megacore: give the parallel C axis >= 2 blocks when the HBM
        # stream is large enough that splitting across the 2 TCs beats fusing
        # the tiny conv epilogue into the streaming kernel.
        if two_tc and c % 256 == 0 and full_bytes > 4 * 1024 * 1024:
            c_tile = c // 2
    else:
        c_tile = None
        hw_tile = None
        if c % 128 == 0:
            # Tile only C: each block keeps the full, contiguous HW extent
            # (largest DMA bursts, no reduction grid axis / accumulator RMW).
            cap_c = block_budget // max(1, n * hw * itemsize)
            ct = _divisor_tile(c, 128, cap_c)
            if ct is not None:
                c_tile, hw_tile = ct, hw
        if c_tile is None:
            # Tile HW (reduction axis, kept last in the grid).  Pad HW to a
            # multiple of 128 with zeros so blocks stay lane-aligned; zero
            # padding does not perturb the sum (inv_hw uses the true H*W).
            hw_pad = (-hw) % 128
            if hw_pad:
                x3 = jnp.pad(x3, ((0, 0), (0, 0), (0, hw_pad)))
            c_tile = _divisor_tile(c, 128, 512) if c % 128 == 0 else c
            hw_cap = block_budget // max(1, n * c_tile * itemsize)
            hw_tile = _divisor_tile(hw + hw_pad, 128, max(hw_cap, 128))
            # TODO(synk): if C is both huge and not a multiple of 128, the
            # (N, C, 128) block may still exceed VMEM; pad C in the caller.

    hw_p = hw + hw_pad
    inv_hw = 1.0 / float(hw)

    # Effective 1-D conv weights: centre (kh, kw) taps, laid out (k, out, in).
    ctr = kernel_size // 2
    w1 = jnp.transpose(w_in[:, :, :, ctr, ctr], (2, 0, 1)).astype(jnp.float32)
    w2 = jnp.transpose(w_out[:, :, :, ctr, ctr], (2, 0, 1)).astype(jnp.float32)
    b1 = b_in.reshape(n, 1).astype(jnp.float32)
    b2 = b_out.reshape(n, 1).astype(jnp.float32)

    # vmem_limit_bytes derived from the actual double-buffered block size.
    x_block_bytes = n * c_tile * hw_tile * itemsize
    aux_bytes = (2 * n * c * 4                      # resident output buffers
                 + 2 * kernel_size * n * n * 4      # w1, w2
                 + 2 * n * 4                        # b1, b2
                 + n * (c + 2) * 4)                 # padded conv scratch
    vmem_limit = min(limit_cap,
                     max(2 * x_block_bytes + aux_bytes + (2 << 20), 16 << 20))

    if c_tile == c:
        # ---------- fused path: pool + epilogue in one kernel ----------
        grid = (hw_p // hw_tile,)
        out2d = pl.pallas_call(
            functools.partial(_fused_pool_conv_kernel, inv_hw=inv_hw),
            out_shape=jax.ShapeDtypeStruct((n, c), jnp.float32),
            grid=grid,
            in_specs=[
                pl.BlockSpec((n, c, hw_tile), lambda hi: (0, 0, hi)),
                pl.BlockSpec(w1.shape, lambda hi: (0, 0, 0)),
                pl.BlockSpec(b1.shape, lambda hi: (0, 0)),
                pl.BlockSpec(w2.shape, lambda hi: (0, 0, 0)),
                pl.BlockSpec(b2.shape, lambda hi: (0, 0)),
            ],
            out_specs=pl.BlockSpec((n, c), lambda hi: (0, 0)),
            scratch_shapes=[pltpu.VMEM((n, c + 2), jnp.float32)],
            compiler_params=pltpu.CompilerParams(
                dimension_semantics=("arbitrary",),
                vmem_limit_bytes=vmem_limit),
        )(x3, w1, b1, w2, b2)
    else:
        # ---------- two-kernel path: gridded pool, then tiny epilogue ----------
        grid = (c // c_tile, hw_p // hw_tile)
        pooled = pl.pallas_call(
            functools.partial(_pool_kernel, inv_hw=inv_hw),
            out_shape=jax.ShapeDtypeStruct((n, c), jnp.float32),
            grid=grid,
            in_specs=[pl.BlockSpec((n, c_tile, hw_tile),
                                   lambda ci, hi: (0, ci, hi))],
            out_specs=pl.BlockSpec((n, c_tile), lambda ci, hi: (0, ci)),
            compiler_params=pltpu.CompilerParams(
                dimension_semantics=("parallel", "arbitrary"),
                vmem_limit_bytes=vmem_limit),
        )(x3)

        out2d = pl.pallas_call(
            _conv_epilogue_kernel,
            out_shape=jax.ShapeDtypeStruct((n, c), jnp.float32),
            in_specs=[pl.BlockSpec(memory_space=pltpu.MemorySpace.VMEM)] * 5,
            out_specs=pl.BlockSpec(memory_space=pltpu.MemorySpace.VMEM),
            scratch_shapes=[pltpu.VMEM((n, c + 2), jnp.float32)],
        )(pooled, w1, b1, w2, b2)

    return out2d.reshape(n, c, 1, 1)


def ca_module_reference(x, w_in, b_in, w_out, b_out):
    """Independent pure-JAX reference using a real 3-D convolution."""
    pooled = jnp.mean(x.astype(jnp.float32), axis=(2, 3))       # (N, C)
    v = pooled[None, :, :, None, None]                          # (1, N, C, 1, 1)

    def conv3d(v, wt, b):
        out = jax.lax.conv_general_dilated(
            v, wt.astype(jnp.float32), window_strides=(1, 1, 1),
            padding=[(1, 1)] * 3,
            dimension_numbers=("NCDHW", "OIDHW", "NCDHW"))
        return out + b.astype(jnp.float32)[None, :, None, None, None]

    hdn = jax.nn.relu(conv3d(v, w_in, b_in))
    y = conv3d(hdn, w_out, b_out)
    return (jax.nn.sigmoid(y) + 1.0)[0]                         # (N, C, 1, 1)


if __name__ == "__main__":
    def make_inputs(key, in_channel, C, H, W, kernel_size=3):
        kx, k1, k2, k3, k4 = jax.random.split(key, 5)
        N = in_channel                     # batch must equal in_channel
        x = jax.random.normal(kx, (N, C, H, W), jnp.float32)
        w_in = 0.2 * jax.random.normal(
            k1, (in_channel, in_channel, kernel_size, kernel_size, kernel_size),
            jnp.float32)
        b_in = 0.1 * jax.random.normal(k2, (in_channel,), jnp.float32)
        w_out = 0.2 * jax.random.normal(
            k3, (in_channel, in_channel, kernel_size, kernel_size, kernel_size),
            jnp.float32)
        b_out = 0.1 * jax.random.normal(k4, (in_channel,), jnp.float32)
        return x, w_in, b_in, w_out, b_out

    # Test A: default generation-aware tiling -> single-block fused kernel.
    args_a = make_inputs(jax.random.PRNGKey(0), in_channel=4, C=8, H=16, W=16)
    out_a = jax.block_until_ready(ca_module_forward(*args_a))
    ref_a = ca_module_reference(*args_a)
    assert out_a.shape == (4, 8, 1, 1), out_a.shape
    if not bool(jnp.allclose(out_a, ref_a, atol=1e-5, rtol=1e-5)):
        raise AssertionError("test A: Pallas kernel does not match reference")

    # Test B: tiny budget forces C tiling -> gridded pool + separate epilogue.
    args_b = make_inputs(jax.random.PRNGKey(1), in_channel=4, C=256, H=16, W=16)
    out_b = jax.block_until_ready(
        ca_module_forward(*args_b, block_budget=600 * 1024))
    ref_b = ca_module_reference(*args_b)
    if not bool(jnp.allclose(out_b, ref_b, atol=1e-5, rtol=1e-5)):
        raise AssertionError("test B: Pallas kernel does not match reference")

    # Test C: ragged H*W (not a multiple of 128) + tiny budget -> zero-padded
    # HW tiling with multi-step fused accumulation.
    args_c = make_inputs(jax.random.PRNGKey(2), in_channel=4, C=8, H=15, W=15)
    out_c = jax.block_until_ready(
        ca_module_forward(*args_c, block_budget=16 * 1024))
    ref_c = ca_module_reference(*args_c)
    if not bool(jnp.allclose(out_c, ref_c, atol=1e-5, rtol=1e-5)):
        raise AssertionError("test C: Pallas kernel does not match reference")

    print("KERNEL_OK")
</pallas_src>

<mosaic_0001>
module attributes {stable_mosaic.version = 11 : i64} {
  func.func @_fused_pool_conv_kernel(%arg0: i32, %arg1: memref<4x8x256xf32, #tpu.memory_space<vmem>>, %arg2: memref<3x4x4xf32, #tpu.memory_space<vmem>>, %arg3: memref<4x1xf32, #tpu.memory_space<vmem>>, %arg4: memref<3x4x4xf32, #tpu.memory_space<vmem>>, %arg5: memref<4x1xf32, #tpu.memory_space<vmem>>, %arg6: memref<4x8xf32, #tpu.memory_space<vmem>>, %arg7: memref<4x10xf32, #tpu.memory_space<vmem>>) attributes {dimension_semantics = [#tpu.dimension_semantics<arbitrary>], iteration_bounds = array<i64: 1>, scalar_prefetch = 0 : i64, scratch_operands = 1 : i64, tpu.core_type = #tpu.core_type<tc>, window_params = [{transform_indices = @transform_0, window_bounds = array<i64: 4, 8, 256>}, {pipeline_mode = #tpu.pipeline_mode<synchronous>, transform_indices = @transform_1, window_bounds = array<i64: 3, 4, 4>}, {pipeline_mode = #tpu.pipeline_mode<synchronous>, transform_indices = @transform_2, window_bounds = array<i64: 4, 1>}, {pipeline_mode = #tpu.pipeline_mode<synchronous>, transform_indices = @transform_3, window_bounds = array<i64: 3, 4, 4>}, {pipeline_mode = #tpu.pipeline_mode<synchronous>, transform_indices = @transform_4, window_bounds = array<i64: 4, 1>}, {pipeline_mode = #tpu.pipeline_mode<synchronous>, transform_indices = @transform_5, window_bounds = array<i64: 4, 8>}]} {
    %c0_i32 = arith.constant 0 : i32
    %0 = arith.cmpi eq, %arg0, %c0_i32 : i32
    %1 = arith.extui %0 : i1 to i32
    %c0_i32_0 = arith.constant 0 : i32
    %2 = arith.cmpi ne, %1, %c0_i32_0 : i32
    scf.if %2 {
      %cst_9 = arith.constant 0.000000e+00 : f32
      %11 = vector.broadcast %cst_9 : f32 to vector<4x8xf32>
      %c0_10 = arith.constant 0 : index
      %c0_11 = arith.constant 0 : index
      %12 = vector.load %arg6[%c0_10, %c0_11] : memref<4x8xf32, #tpu.memory_space<vmem>>, vector<4x8xf32>
      tpu.vector_store %arg6[%c0_10, %c0_11], %11 {strides = array<i32>} : memref<4x8xf32, #tpu.memory_space<vmem>>, vector<4x8xf32>,
    } else {
    }
    %c0 = arith.constant 0 : index
    %c0_1 = arith.constant 0 : index
    %3 = vector.load %arg6[%c0, %c0_1] : memref<4x8xf32, #tpu.memory_space<vmem>>, vector<4x8xf32>
    %c0_2 = arith.constant 0 : index
    %c0_3 = arith.constant 0 : index
    %c0_4 = arith.constant 0 : index
    %4 = vector.load %arg1[%c0_2, %c0_3, %c0_4] : memref<4x8x256xf32, #tpu.memory_space<vmem>>, vector<4x8x256xf32>
    %cst = arith.constant dense<0.000000e+00> : vector<4x8xf32>
    %5 = vector.multi_reduction <add>, %4, %cst [2] : vector<4x8x256xf32> to vector<4x8xf32>
    %6 = arith.addf %3, %5 : vector<4x8xf32>
    %c0_5 = arith.constant 0 : index
    %c0_6 = arith.constant 0 : index
    %7 = vector.load %arg6[%c0_5, %c0_6] : memref<4x8xf32, #tpu.memory_space<vmem>>, vector<4x8xf32>
    tpu.vector_store %arg6[%c0_5, %c0_6], %6 {strides = array<i32>} : memref<4x8xf32, #tpu.memory_space<vmem>>, vector<4x8xf32>,
    %c0_i32_7 = arith.constant 0 : i32
    %8 = arith.cmpi eq, %arg0, %c0_i32_7 : i32
    %9 = arith.extui %8 : i1 to i32
    %c0_i32_8 = arith.constant 0 : i32
    %10 = arith.cmpi ne, %9, %c0_i32_8 : i32
    scf.if %10 {
      %c0_9 = arith.constant 0 : index
      %c0_10 = arith.constant 0 : index
      %11 = vector.load %arg6[%c0_9, %c0_10] : memref<4x8xf32, #tpu.memory_space<vmem>>, vector<4x8xf32>
      %cst_11 = arith.constant 3.906250e-03 : f32
      %12 = vector.broadcast %cst_11 : f32 to vector<4x8xf32>
      %13 = arith.mulf %11, %12 : vector<4x8xf32>
      %cst_12 = arith.constant 0.000000e+00 : f32
      %14 = vector.broadcast %cst_12 : f32 to vector<4x1xf32>
      %c0_13 = arith.constant 0 : index
      %c0_14 = arith.constant 0 : index
      %15 = vector.load %arg7[%c0_13, %c0_14] : memref<4x10xf32, #tpu.memory_space<vmem>>, vector<4x1xf32>
      tpu.vector_store %arg7[%c0_13, %c0_14], %14 {strides = array<i32>} : memref<4x10xf32, #tpu.memory_space<vmem>>, vector<4x1xf32>,
      %cst_15 = arith.constant 0.000000e+00 : f32
      %16 = vector.broadcast %cst_15 : f32 to vector<4x1xf32>
      %c0_16 = arith.constant 0 : index
      %c9 = arith.constant 9 : index
      %17 = vector.load %arg7[%c0_16, %c9] : memref<4x10xf32, #tpu.memory_space<vmem>>, vector<4x1xf32>
      tpu.vector_store %arg7[%c0_16, %c9], %16 {strides = array<i32>} : memref<4x10xf32, #tpu.memory_space<vmem>>, vector<4x1xf32>,
      %c0_17 = arith.constant 0 : index
      %c1 = arith.constant 1 : index
      %18 = vector.load %arg7[%c0_17, %c1] : memref<4x10xf32, #tpu.memory_space<vmem>>, vector<4x8xf32>
      tpu.vector_store %arg7[%c0_17, %c1], %13 {strides = array<i32>} : memref<4x10xf32, #tpu.memory_space<vmem>>, vector<4x8xf32>,
      %c0_18 = arith.constant 0 : index
      %c0_19 = arith.constant 0 : index
      %19 = vector.load %arg3[%c0_18, %c0_19] : memref<4x1xf32, #tpu.memory_space<vmem>>, vector<4x1xf32>
      %20 = vector.shape_cast %19 : vector<4x1xf32> to vector<4x1xf32>
      %21 = vector.broadcast %20 : vector<4x1xf32> to vector<4x8xf32>
      %c0_20 = arith.constant 0 : index
      %c0_21 = arith.constant 0 : index
      %c0_22 = arith.constant 0 : index
      %22 = vector.load %arg2[%c0_20, %c0_21, %c0_22] : memref<3x4x4xf32, #tpu.memory_space<vmem>>, vector<1x4x4xf32>
      %23 = vector.shape_cast %22 : vector<1x4x4xf32> to vector<4x4xf32>
      %c0_23 = arith.constant 0 : index
      %c0_24 = arith.constant 0 : index
      %24 = vector.load %arg7[%c0_23, %c0_24] : memref<4x10xf32, #tpu.memory_space<vmem>>, vector<4x8xf32>
      %cst_25 = arith.constant dense<0.000000e+00> : vector<4x8xf32>
      %25 = tpu.matmul %23, %24, %cst_25 {dimension_numbers = #tpu.dot_dimension_numbers<[1], [0], [0], [1], [0, 0, 1, 1], [], []>} : vector<4x4xf32>, vector<4x8xf32>, vector<4x8xf32> -> vector<4x8xf32>
      %26 = arith.addf %21, %25 : vector<4x8xf32>
      %c1_26 = arith.constant 1 : index
      %c0_27 = arith.constant 0 : index
      %c0_28 = arith.constant 0 : index
      %27 = vector.load %arg2[%c1_26, %c0_27, %c0_28] : memref<3x4x4xf32, #tpu.memory_space<vmem>>, vector<1x4x4xf32>
      %28 = vector.shape_cast %27 : vector<1x4x4xf32> to vector<4x4xf32>
      %c0_29 = arith.constant 0 : index
      %c1_30 = arith.constant 1 : index
      %29 = vector.load %arg7[%c0_29, %c1_30] : memref<4x10xf32, #tpu.memory_space<vmem>>, vector<4x8xf32>
      %cst_31 = arith.constant dense<0.000000e+00> : vector<4x8xf32>
      %30 = tpu.matmul %28, %29, %cst_31 {dimension_numbers = #tpu.dot_dimension_numbers<[1], [0], [0], [1], [0, 0, 1, 1], [], []>} : vector<4x4xf32>, vector<4x8xf32>, vector<4x8xf32> -> vector<4x8xf32>
      %31 = arith.addf %26, %30 : vector<4x8xf32>
      %c2 = arith.constant 2 : index
      %c0_32 = arith.constant 0 : index
      %c0_33 = arith.constant 0 : index
      %32 = vector.load %arg2[%c2, %c0_32, %c0_33] : memref<3x4x4xf32, #tpu.memory_space<vmem>>, vector<1x4x4xf32>
      %33 = vector.shape_cast %32 : vector<1x4x4xf32> to vector<4x4xf32>
      %c0_34 = arith.constant 0 : index
      %c2_35 = arith.constant 2 : index
      %34 = vector.load %arg7[%c0_34, %c2_35] : memref<4x10xf32, #tpu.memory_space<vmem>>, vector<4x8xf32>
      %cst_36 = arith.constant dense<0.000000e+00> : vector<4x8xf32>
      %35 = tpu.matmul %33, %34, %cst_36 {dimension_numbers = #tpu.dot_dimension_numbers<[1], [0], [0], [1], [0, 0, 1, 1], [], []>} : vector<4x4xf32>, vector<4x8xf32>, vector<4x8xf32> -> vector<4x8xf32>
      %36 = arith.addf %31, %35 : vector<4x8xf32>
      %cst_37 = arith.constant 0.000000e+00 : f32
      %37 = vector.broadcast %cst_37 : f32 to vector<4x8xf32>
      %38 = arith.maximumf %36, %37 : vector<4x8xf32>
      %c0_38 = arith.constant 0 : index
      %c1_39 = arith.constant 1 : index
      %39 = vector.load %arg7[%c0_38, %c1_39] : memref<4x10xf32, #tpu.memory_space<vmem>>, vector<4x8xf32>
      tpu.vector_store %arg7[%c0_38, %c1_39], %38 {strides = array<i32>} : memref<4x10xf32, #tpu.memory_space<vmem>>, vector<4x8xf32>,
      %c0_40 = arith.constant 0 : index
      %c0_41 = arith.constant 0 : index
      %40 = vector.load %arg5[%c0_40, %c0_41] : memref<4x1xf32, #tpu.memory_space<vmem>>, vector<4x1xf32>
      %41 = vector.shape_cast %40 : vector<4x1xf32> to vector<4x1xf32>
      %42 = vector.broadcast %41 : vector<4x1xf32> to vector<4x8xf32>
      %c0_42 = arith.constant 0 : index
      %c0_43 = arith.constant 0 : index
      %c0_44 = arith.constant 0 : index
      %43 = vector.load %arg4[%c0_42, %c0_43, %c0_44] : memref<3x4x4xf32, #tpu.memory_space<vmem>>, vector<1x4x4xf32>
      %44 = vector.shape_cast %43 : vector<1x4x4xf32> to vector<4x4xf32>
      %c0_45 = arith.constant 0 : index
      %c0_46 = arith.constant 0 : index
      %45 = vector.load %arg7[%c0_45, %c0_46] : memref<4x10xf32, #tpu.memory_space<vmem>>, vector<4x8xf32>
      %cst_47 = arith.constant dense<0.000000e+00> : vector<4x8xf32>
      %46 = tpu.matmul %44, %45, %cst_47 {dimension_numbers = #tpu.dot_dimension_numbers<[1], [0], [0], [1], [0, 0, 1, 1], [], []>} : vector<4x4xf32>, vector<4x8xf32>, vector<4x8xf32> -> vector<4x8xf32>
      %47 = arith.addf %42, %46 : vector<4x8xf32>
      %c1_48 = arith.constant 1 : index
      %c0_49 = arith.constant 0 : index
      %c0_50 = arith.constant 0 : index
      %48 = vector.load %arg4[%c1_48, %c0_49, %c0_50] : memref<3x4x4xf32, #tpu.memory_space<vmem>>, vector<1x4x4xf32>
      %49 = vector.shape_cast %48 : vector<1x4x4xf32> to vector<4x4xf32>
      %c0_51 = arith.constant 0 : index
      %c1_52 = arith.constant 1 : index
      %50 = vector.load %arg7[%c0_51, %c1_52] : memref<4x10xf32, #tpu.memory_space<vmem>>, vector<4x8xf32>
      %cst_53 = arith.constant dense<0.000000e+00> : vector<4x8xf32>
      %51 = tpu.matmul %49, %50, %cst_53 {dimension_numbers = #tpu.dot_dimension_numbers<[1], [0], [0], [1], [0, 0, 1, 1], [], []>} : vector<4x4xf32>, vector<4x8xf32>, vector<4x8xf32> -> vector<4x8xf32>
      %52 = arith.addf %47, %51 : vector<4x8xf32>
      %c2_54 = arith.constant 2 : index
      %c0_55 = arith.constant 0 : index
      %c0_56 = arith.constant 0 : index
      %53 = vector.load %arg4[%c2_54, %c0_55, %c0_56] : memref<3x4x4xf32, #tpu.memory_space<vmem>>, vector<1x4x4xf32>
      %54 = vector.shape_cast %53 : vector<1x4x4xf32> to vector<4x4xf32>
      %c0_57 = arith.constant 0 : index
      %c2_58 = arith.constant 2 : index
      %55 = vector.load %arg7[%c0_57, %c2_58] : memref<4x10xf32, #tpu.memory_space<vmem>>, vector<4x8xf32>
      %cst_59 = arith.constant dense<0.000000e+00> : vector<4x8xf32>
      %56 = tpu.matmul %54, %55, %cst_59 {dimension_numbers = #tpu.dot_dimension_numbers<[1], [0], [0], [1], [0, 0, 1, 1], [], []>} : vector<4x4xf32>, vector<4x8xf32>, vector<4x8xf32> -> vector<4x8xf32>
      %57 = arith.addf %52, %56 : vector<4x8xf32>
      %58 = arith.negf %57 : vector<4x8xf32>
      %59 = math.exp %58 : vector<4x8xf32>
      %cst_60 = arith.constant 1.000000e+00 : f32
      %60 = vector.broadcast %cst_60 : f32 to vector<4x8xf32>
      %61 = arith.addf %60, %59 : vector<4x8xf32>
      %62 = arith.divf %60, %61 : vector<4x8xf32>
      %cst_61 = arith.constant 1.000000e+00 : f32
      %63 = vector.broadcast %cst_61 : f32 to vector<4x8xf32>
      %64 = arith.addf %62, %63 : vector<4x8xf32>
      %c0_62 = arith.constant 0 : index
      %c0_63 = arith.constant 0 : index
      %65 = vector.load %arg6[%c0_62, %c0_63] : memref<4x8xf32, #tpu.memory_space<vmem>>, vector<4x8xf32>
      tpu.vector_store %arg6[%c0_62, %c0_63], %64 {strides = array<i32>} : memref<4x8xf32, #tpu.memory_space<vmem>>, vector<4x8xf32>,
    } else {
    }
    return
  }
  func.func @transform_0(%arg0: i32) -> (i32, i32, i32) {
    %c0_i32 = arith.constant 0 : i32
    %c0_i32_0 = arith.constant 0 : i32
    %c0_i32_1 = arith.constant 0 : i32
    return %c0_i32, %c0_i32_0, %arg0 : i32, i32, i32
  }
  func.func @transform_1(%arg0: i32) -> (i32, i32, i32) {
    %c0_i32 = arith.constant 0 : i32
    %c0_i32_0 = arith.constant 0 : i32
    %c0_i32_1 = arith.constant 0 : i32
    %c0_i32_2 = arith.constant 0 : i32
    return %c0_i32, %c0_i32_0, %c0_i32_1 : i32, i32, i32
  }
  func.func @transform_2(%arg0: i32) -> (i32, i32) {
    %c0_i32 = arith.constant 0 : i32
    %c0_i32_0 = arith.constant 0 : i32
    %c0_i32_1 = arith.constant 0 : i32
    return %c0_i32, %c0_i32_0 : i32, i32
  }
  func.func @transform_3(%arg0: i32) -> (i32, i32, i32) {
    %c0_i32 = arith.constant 0 : i32
    %c0_i32_0 = arith.constant 0 : i32
    %c0_i32_1 = arith.constant 0 : i32
    %c0_i32_2 = arith.constant 0 : i32
    return %c0_i32, %c0_i32_0, %c0_i32_1 : i32, i32, i32
  }
  func.func @transform_4(%arg0: i32) -> (i32, i32) {
    %c0_i32 = arith.constant 0 : i32
    %c0_i32_0 = arith.constant 0 : i32
    %c0_i32_1 = arith.constant 0 : i32
    return %c0_i32, %c0_i32_0 : i32, i32
  }
  func.func @transform_5(%arg0: i32) -> (i32, i32) {
    %c0_i32 = arith.constant 0 : i32
    %c0_i32_0 = arith.constant 0 : i32
    %c0_i32_1 = arith.constant 0 : i32
    return %c0_i32, %c0_i32_0 : i32, i32
  }
}

</mosaic_0001>

<bundles_post_ra>
// kernel: tpu_custom_call.1
= control target key start
LH: loop header
LB: loop body
LE: loop exit
PB: predicated region body
PF: predicated region fallthrough
CT: control target
= control target key end

     0   :  { %10 = vsyncpa [#allocation4], 0  ;;  %s898_s0 = inlined_call_operand.hbm [shape: f32[4,8,256], index: 0, kind: input, shape index: {}]   ;;  %s899_s1 = inlined_call_operand.hbm [shape: f32[3,4,4], index: 1, kind: input, shape index: {}]   ;;  %s900_s2 = inlined_call_operand.vmem [shape: f32[4,1], index: 2, kind: input, shape index: {}]   ;;  %s901_s3 = inlined_call_operand.vmem [shape: f32[3,4,4], index: 3, kind: input, shape index: {}]   ;;  %s902_s4 = inlined_call_operand.vmem [shape: f32[4,1], index: 4, kind: input, shape index: {}]   ;;  %s903_s5 = inlined_call_operand.hbm [shape: f32[4,8], index: 5, kind: output, shape index: {}]  }
   0x1   :  { %11 = vsyncpa [#allocation7], 0 }
   0x2   :  { %12 = vsyncpa [#allocation5], 0  ;;  %s787_s18 = smov [#allocation3]  }
   0x3   :  { %s18_s19 = sshll.u32 %s787_s18, 4  ;;  %s19_s19 = int_to_ptr.vmem [resolvable:$true] %s18_s19 }
   0x4   :  { %s729_s20 = scalar_lea.vmem %s19_s19, 1024  ;;  %p734_p1 = scmp.lt.s32.totalorder %s19_s19, %s19_s19 }
   0x5   :  { %p730_p0 = scmp.ne.s32.totalorder %s19_s19, %s729_s20  ;;  %p735_p2 = scmp.lt.s32.totalorder %s729_s20, %s729_s20 }
   0x7   :  { %p736_p3 = por %p735_p2, %p734_p1 }
   0x9   :  { %p737_p4 = pnand %p736_p3, %p730_p0 }
   0xb   :  { %740 = shalt.err (!%p737_p4)
}
   0xc   :  { %s788_s21 = smov 256   ;;  %s789_s22 = smov 16  }
   0xd   :  { %24 = dma.hbm_to_vmem [thread:$0]  %s898_s0, 1024, %s19_s19, [#allocation4], %s788_s21, %s788_s21, %s789_s22  }
   0xe   :  { %s790_s25 = smov [#allocation6]  }
   0xf   :  { %s30_s26 = sshll.u32 %s790_s25, 4  ;;  %s31_s26 = int_to_ptr.vmem [resolvable:$true] %s30_s26 }
  0x10   :  { %s749_s27 = scalar_lea.vmem %s31_s26, 192  ;;  %p754_p6 = scmp.lt.s32.totalorder %s31_s26, %s31_s26 }
  0x11   :  { %p750_p5 = scmp.ne.s32.totalorder %s31_s26, %s749_s27  ;;  %p755_p7 = scmp.lt.s32.totalorder %s749_s27, %s749_s27 }
  0x13   :  { %p756_p8 = por %p755_p7, %p754_p6 }
  0x15   :  { %p757_p9 = pnand %p756_p8, %p750_p5 }
  0x17   :  { %760 = shalt.err (!%p757_p9)
}
  0x18   :  { %s791_s28 = smov 64   ;;  %s792_s29 = smov 4  }
  0x19   :  { %36 = dma.hbm_to_vmem [thread:$0]  %s899_s1, 192, %s31_s26, [#allocation7], %s791_s28, %s791_s28, %s792_s29  }
  0x1a   :  { %781 = dma.done.wait [#allocation4], 1024  }
  0x1b   :  { %782 = vsyncadd [#allocation4], 4294966272 }
  0x1c   :  { %783 = dma.done.wait [#allocation7], 192  }
  0x1d   :  { %784 = vsyncadd [#allocation7], 4294967104  ;;  %v56_v0 = vld [vmem:[#allocation3] sm:$0xff]  ;;  %v57_v1 = vld [vmem:[#allocation3 + $0x8] sm:$0xff]  ;;  %vm53_vm0 = vcmask 60416   ;;  %v793_v12 = vmov 0.0   ;;  %v80_v13 = vlaneseq }
  0x1e   :  { %v60_v2 = vld [vmem:[#allocation3 + $0x20] sm:$0xff]  ;;  %v64_v3 = vadd.f32 %v57_v1, %v56_v0  ;;  %v61_v4 = vld [vmem:[#allocation3 + $0x28] sm:$0xff]  ;;  %v58_v5 = vld [vmem:[#allocation3 + $0x10] sm:$0xff]  ;;  %54 = vst.msk [vmem:[#allocation8] sm:$0xf] %vm53_vm0, %v793_v12  ;;  %672 = vmatprep.subr.mxu0 %v793_v12  ;;  %677 = vmatprep.subr.mxu1 %v793_v12  ;;  %vm113_vm1 = vcmask 3072  }
  0x1f   :  { %v59_v6 = vld [vmem:[#allocation3 + $0x18] sm:$0xff]  ;;  %v70_v7 = vadd.f32 %v61_v4, %v60_v2  ;;  %v62_v8 = vld [vmem:[#allocation3 + $0x30] sm:$0xff]  ;;  %vm115_vm2 = vcmask 76872   ;;  %114 = vst.msk [vmem:[#allocation2] sm:$0xf] %vm113_vm1, %v793_v12  ;;  %v81_v14 = vand.u32 127, %v80_v13 }
  0x20   :  { %v63_v9 = vld [vmem:[#allocation3 + $0x38] sm:$0xff]  ;;  %65 = vadd.xlane.f32.xlu0 %v64_v3  ;;  %v67_v10 = vadd.f32 %v59_v6, %v58_v5  ;;  %116 = vst.msk [vmem:[#allocation2] sm:$0xf] %vm115_vm2, %v793_v12  ;;  %v83_v15 = vshrl.u32 %v80_v13, 7  ;;  %vm98_vm3 = vcmask 1041409   ;;  %vm100_vm4 = vcmask 1042434  }
  0x21   :  { %71 = vadd.xlane.f32.xlu1 %v70_v7  ;;  %v73_v11 = vadd.f32 %v63_v9, %v62_v8  ;;  %vm102_vm5 = vcmask 1043459   ;;  %s794_s0 = smov 1   ;;  %vm795_vm6 = vmmov 0   ;;  %vm121_vm7 = vcmask 68616   ;;  %v129_v34 = vld [vmem:[#allocation6] sm:$0xf] }
  0x22   :  { %v84_v17 = vsub.s32 %v81_v14, %v83_v15  ;;  %674 = vmatprep.mubr.msk.f32.mxu0 %vm795_vm6, %v793_v12  ;;  %679 = vmatprep.mubr.msk.f32.mxu1 %vm795_vm6, %v793_v12  ;;  %v796_v33 = vmov 0   ;;  %vm135_vm8 = vcmask 1043456   ;;  %vm131_vm9 = vcmask 31744   ;;  %s797_s1 = smov 127   ;;  %s798_s7 = smov 126  }
  0x23   :  { %715 = vset.pattern.permute.xlu1 %v796_v33  ;;  %716 = vset.pattern.permute.xlu0 %v796_v33  ;;  %v123_v36 = vld [vmem:[%s900_s2] sm:$0xf]  ;;  %v211_v37 = vld [vmem:[#allocation6 + $0x4] sm:$0xf]  ;;  %v291_v39 = vld [vmem:[#allocation6 + $0x8] sm:$0xf] }
  0x24   :  { %68 = vadd.xlane.f32.xlu0 %v67_v10  ;;  %v382_v54 = vld [vmem:[%s901_s3] sm:$0xf]  ;;  %v653_v56 = vld [vmem:[%s901_s3 + $0x4] sm:$0xf]  ;;  %v656_v57 = vld [vmem:[%s901_s3 + $0x8] sm:$0xf] }
  0x25   :  { %74 = vadd.xlane.f32.xlu1 %v73_v11  ;;  %v55_v26 = vld [vmem:[#allocation8] sm:$0xf]  ;;  %v376_v55 = vld [vmem:[%s902_s4] sm:$0xf]  ;;  %s799_s3 = smov [#allocation8]  }
  0x26   :  { %s635_s4 = sshll.u32 %s799_s3, 4  ;;  %s636_s4 = int_to_ptr.vmem [resolvable:$true] %s635_s4 }
  0x27   :  { %s761_s17 = scalar_lea.vmem %s636_s4, 64  ;;  %p766_p11 = scmp.lt.s32.totalorder %s636_s4, %s636_s4 }
  0x28   :  { %p762_p10 = scmp.ne.s32.totalorder %s636_s4, %s761_s17  ;;  %p767_p12 = scmp.lt.s32.totalorder %s761_s17, %s761_s17 }
  0x2a   :  { %p768_p13 = por %p767_p12, %p766_p11 }
  0x2c   :  { %p769_p0 = pnand %p768_p13, %p762_p10 }
  0xa9   :  { %v66_v16 = vpop.xlane.xlu0 %65 }
  0xaa   :  { %v72_v18 = vpop.xlane.xlu1 %71  ;;  %v85_v20 = vrot.slane %v66_v16, %v84_v17 }
  0xab   :  { %v93_v23 = vrot.slane %v72_v18, %v84_v17 }
  0xad   :  { %v69_v19 = vpop.xlane.xlu0 %68 }
  0xae   :  { %v89_v21 = vrot.slane %v69_v19, %v84_v17  ;;  %v75_v22 = vpop.xlane.xlu1 %74 }
  0xaf   :  { %v97_v24 = vrot.slane %v75_v22, %v84_v17 }
  0xb0   :  { %v99_v25 = vsel %vm98_vm3, %v89_v21, %v85_v20 }
  0xb1   :  { %v101_v27 = vsel %vm100_vm4, %v93_v23, %v99_v25 }
  0xb2   :  { %v103_v28 = vsel %vm102_vm5, %v97_v24, %v101_v27 }
  0xb3   :  { %v105_v29 = vadd.f32 %v103_v28, %v55_v26 }
  0xb5   :  { %107 = vst.msk [vmem:[#allocation8] sm:$0xf] %vm53_vm0, %v105_v29 }
  0xbc   :  { %v111_v30 = vld [vmem:[#allocation8] sm:$0xf] }
  0xbd   :  { %v112_v31 = vmul.f32 0.00390625, %v111_v30 }
  0xbf   :  { %118 = vrot.lane.b32.xlu0 %v112_v31, %s794_s0 }
 0x131   :  { %v119_v32 = vpop.permute.xlu0 %118 }
 0x132   :  { %122 = vst.msk [vmem:[#allocation2] sm:$0xf] %vm121_vm7, %v119_v32 }
 0x139   :  { %v130_v35 = vld [vmem:[#allocation2] sm:$0xf] }
 0x13a   :  { %212 = vrot.lane.b32.xlu1 %v130_v35, %s797_s1  ;;  %673 = vmatpush3.msk.msra.mxu0 %vm135_vm8, %v130_v35 }
 0x13b   :  { %675 = vmatmul.mubr.msk.f32.vlgmr.msra.gmra.mxu0 %vm131_vm9, %v129_v34  ;;  %682 = vmatprep.subr.mxu0 %v793_v12 }
 0x13c   :  { %684 = vmatprep.mubr.msk.f32.mxu0 %vm795_vm6, %v793_v12 }
 0x13e   :  { %292 = vrot.lane.b32.xlu1 %v130_v35, %s798_s7 }
 0x142   :  { %126 = vperm.xlu1 %715, %v123_v36  }
 0x1ac   :  { %v213_v38 = vpop.permute.xlu1 %212 }
 0x1ad   :  { %678 = vmatpush3.msk.msra.mxu1 %vm135_vm8, %v213_v38 }
 0x1ae   :  { %680 = vmatmul.mubr.msk.f32.vlgmr.msra.gmra.mxu1 %vm131_vm9, %v211_v37  ;;  %687 = vmatprep.subr.mxu1 %v793_v12 }
 0x1af   :  { %689 = vmatprep.mubr.msk.f32.mxu1 %vm795_vm6, %v793_v12 }
 0x1b0   :  { %v293_v40 = vpop.permute.xlu1 %292 }
 0x1b1   :  { %683 = vmatpush3.msk.msra.mxu0 %vm135_vm8, %v293_v40 }
 0x1b2   :  { %685 = vmatmul.mubr.msk.f32.vlgmr.msra.gmra.mxu0 %vm131_vm9, %v291_v39  ;;  %692 = vmatprep.subr.mxu0 %v793_v12 }
 0x1b3   :  { %694 = vmatprep.mubr.msk.f32.mxu0 %vm795_vm6, %v793_v12 }
 0x1bd   :  { %v127_v43 = vpop.permute.xlu1 %126 }
 0x1fb   :  { %v205_v41 = vpop.f32.mrf.mxu0 }
 0x1fc   :  { %v209_v44 = vadd.f32 %v205_v41, %v127_v43 }
 0x1fd   :  { %v676_v42 = vpop.f32.mrf.mxu0 }
 0x26e   :  { %v285_v45 = vpop.f32.mrf.mxu1 }
 0x26f   :  { %v289_v46 = vadd.f32 %v285_v45, %v209_v44 }
 0x270   :  { %v681_v47 = vpop.f32.mrf.mxu1 }
 0x272   :  { %v365_v48 = vpop.f32.mrf.mxu0 }
 0x273   :  { %v369_v49 = vadd.f32 %v365_v48, %v289_v46 }
 0x274   :  { %v686_v50 = vpop.f32.mrf.mxu0 }
 0x275   :  { %v370_v51 = vmax.f32 %v369_v49, 0.0 }
 0x277   :  { %372 = vrot.lane.b32.xlu0 %v370_v51, %s794_s0 }
 0x2e9   :  { %v373_v52 = vpop.permute.xlu0 %372 }
 0x2ea   :  { %375 = vst.msk [vmem:[#allocation2] sm:$0xf] %vm121_vm7, %v373_v52 }
 0x2f1   :  { %v383_v53 = vld [vmem:[#allocation2] sm:$0xf] }
 0x2f2   :  { %543 = vrot.lane.b32.xlu0 %v383_v53, %s798_s7  ;;  %463 = vrot.lane.b32.xlu1 %v383_v53, %s797_s1 }
 0x2f3   :  { %688 = vmatpush3.msk.msra.mxu1 %vm135_vm8, %v383_v53 }
 0x2f4   :  { %690 = vmatmul.mubr.msk.f32.vlgmr.msra.gmra.mxu1 %vm131_vm9, %v382_v54  ;;  %697 = vmatprep.subr.mxu1 %v793_v12 }
 0x2f5   :  { %699 = vmatprep.mubr.msk.f32.mxu1 %vm795_vm6, %v793_v12 }
 0x2f6   :  { %379 = vperm.xlu1 %715, %v376_v55  }
 0x364   :  { %v544_v58 = vpop.permute.xlu0 %543  ;;  %v464_v59 = vpop.permute.xlu1 %463 }
 0x365   :  { %693 = vmatpush3.msk.msra.mxu0 %vm135_vm8, %v464_v59  ;;  %698 = vmatpush3.msk.msra.mxu1 %vm135_vm8, %v544_v58 }
 0x366   :  { %695 = vmatmul.mubr.msk.f32.vlgmr.msra.gmra.mxu0 %vm131_vm9, %v653_v56  ;;  %700 = vmatmul.mubr.msk.f32.vlgmr.msra.gmra.mxu1 %vm131_vm9, %v656_v57 }
 0x371   :  { %v380_v62 = vpop.permute.xlu1 %379 }
 0x3b4   :  { %v456_v60 = vpop.f32.mrf.mxu1 }
 0x3b5   :  { %v460_v63 = vadd.f32 %v456_v60, %v380_v62 }
 0x3b6   :  { %v691_v61 = vpop.f32.mrf.mxu1 }
 0x426   :  { %v536_v0 = vpop.f32.mrf.mxu0  ;;  %v616_v1 = vpop.f32.mrf.mxu1 }
 0x427   :  { %v540_v2 = vadd.f32 %v536_v0, %v460_v63 }
 0x428   :  { %v696_v3 = vpop.f32.mrf.mxu0  ;;  %v701_v4 = vpop.f32.mrf.mxu1 }
 0x429   :  { %v620_v5 = vadd.f32 %v616_v1, %v540_v2 }
 0x42b   :  { %v659_v6 = vmul.f32 -1.442695, %v620_v5 }
 0x42d   :  { %717 = vpow2.f32 %v659_v6 }
 0x43a   :  { %v718_v7 = vpop.eup %717 }
 0x43b   :  { %v624_v8 = vadd.f32 1.0, %v718_v7 }
 0x43d   :  { %719 = vrcp.f32 %v624_v8 }
 0x44a   :  { %v720_v9 = vpop.eup %719 }
 0x44b   :  { %v627_v10 = vadd.f32 1.0, %v720_v9 }
 0x44d   :  { %628 = vst.msk [vmem:[#allocation8] sm:$0xf] %vm53_vm0, %v627_v10 }
 0x44e   :  { %772 = shalt.err (!%p769_p0)
}
 0x44f   :  { %638 = dma.vmem_to_hbm [thread:$0]  %s636_s4, 64, %s903_s5, [#allocation5]  }
 0x450   :  { %785 = dma.done.wait [#allocation5], 64  }
 0x451   :  { %786 = vsyncadd [#allocation5], 4294967232 }
 0x452   :  { %642 = vsyncpa [#allocation4], 1 }
 0x453   :  { %643 = vsyncpa [#allocation7], 1 }
 0x454   :  { %644 = vsyncpa [#allocation5], 1 }

</bundles_post_ra>
